<compile_context>
chip_gen: v7x
topology: tpu7x:2x2x1
jax: 0.10.0
libtpu: 0.0.40
codegen_flags: <defaults>
</compile_context>

<pallas_src>
import functools

import jax
import jax.numpy as jnp
from jax.experimental import pallas as pl
from jax.experimental.pallas import tpu as pltpu


def _mm_nt(a, b):
    """a @ b.T with fp32 accumulation: (m, k) x (n, k) -> (m, n)."""
    return jax.lax.dot_general(a, b, (((1,), (1,)), ((), ())),
                               preferred_element_type=jnp.float32)


def _mm_nn(a, b):
    """a @ b with fp32 accumulation: (m, k) x (k, n) -> (m, n)."""
    return jax.lax.dot_general(a, b, (((1,), (0,)), ((), ())),
                               preferred_element_type=jnp.float32)


# --------------------------------------------------------------------------- #
# Kernel A: fused qkv projection (x streamed exactly once, weight resident).
# --------------------------------------------------------------------------- #
def _qkv_proj_kernel(x_ref, w_ref, q_ref, k_ref, v_ref, *,
                     num_heads, head_dim, mm_dtype):
    D = num_heads * head_dim
    x = x_ref[0].astype(mm_dtype)                       # (tm, C)
    # One big MXU matmul: C-deep contraction, 3D-wide output.
    y = _mm_nt(x, w_ref[...])                           # (tm, 3D) fp32
    # Scatter per-head tiles with static lane slices / static major-index stores.
    for h in range(num_heads):
        q_ref[0, h] = y[:, h * head_dim:(h + 1) * head_dim].astype(q_ref.dtype)
        k_ref[0, h] = y[:, D + h * head_dim:D + (h + 1) * head_dim].astype(k_ref.dtype)
        v_ref[0, h] = y[:, 2 * D + h * head_dim:2 * D + (h + 1) * head_dim].astype(v_ref.dtype)


# --------------------------------------------------------------------------- #
# Kernel B: head-batched flash attention + head-concat output projection.
# --------------------------------------------------------------------------- #
def _flash_attn_proj_kernel(q_ref, k_ref, v_ref, wp_ref, bp_ref, o_ref,
                            m_sc, l_sc, acc_sc, y_sc, *,
                            num_heads, head_dim, mm_dtype, approx_recip):
    kv = pl.program_id(2)
    n_kv = pl.num_programs(2)

    @pl.when(kv == 0)
    def _():
        m_sc[...] = jnp.full_like(m_sc, -jnp.inf)
        l_sc[...] = jnp.zeros_like(l_sc)
        acc_sc[...] = jnp.zeros_like(acc_sc)

    q = q_ref[0]                                         # (H, tq, hd)  (scale baked in)
    k = k_ref[0]                                         # (H, tkv, hd)
    v = v_ref[0]                                         # (H, tkv, hd)

    # Scores for all heads at once (serializes into per-head MXU matmuls).
    s = jnp.einsum('hqd,hkd->hqk', q, k,
                   preferred_element_type=jnp.float32)   # (H, tq, tkv) fp32

    m_prev = m_sc[...]                                   # (H, tq, 1)
    m_new = jnp.maximum(m_prev, jnp.max(s, axis=-1, keepdims=True))
    alpha = jnp.exp(m_prev - m_new)
    # In bf16 mode the exp runs on bf16 operands (EUP relief); max already subtracted.
    p = jnp.exp((s - m_new).astype(mm_dtype))
    l_sc[...] = alpha * l_sc[...] + jnp.sum(p, axis=-1, keepdims=True,
                                            dtype=jnp.float32)
    pv = jnp.einsum('hqk,hkd->hqd', p.astype(mm_dtype), v,
                    preferred_element_type=jnp.float32)  # (H, tq, hd) fp32
    acc_sc[...] = alpha * acc_sc[...] + pv
    m_sc[...] = m_new

    # Finalize: normalize, concatenate heads into (tq, D) and do ONE D-deep
    # output projection; lane-dense (tq, C) store.
    @pl.when(kv == n_kv - 1)
    def _():
        if approx_recip:
            out = acc_sc[...] * pl.reciprocal(l_sc[...], approx=True)
        else:
            out = acc_sc[...] / l_sc[...]
        out = out.astype(mm_dtype)                       # (H, tq, hd)
        for h in range(num_heads):                       # static head-concat stores
            y_sc[:, h * head_dim:(h + 1) * head_dim] = out[h]
        proj = _mm_nn(y_sc[...], wp_ref[...])            # (tq, D) x (D, C) -> (tq, C)
        o_ref[0] = (proj + bp_ref[...]).astype(o_ref.dtype)


def _pick_tile(n):
    for t in (512, 256, 128, 64, 32, 16, 8):
        if n % t == 0:
            return t
    return n


def attention_forward(x, w_qkv, w_proj, b_proj, *, num_heads, H=None, W=None,
                      rel_pos_bias=None, q_tile=None, kv_tile=None, row_tile=None,
                      mxu_dtype=None, vmem_limit_bytes=48 * 1024 * 1024):
    """x: (B, N, C). w_qkv: (3D, C) PyTorch layout. w_proj: (C, D). b_proj: (C,).

    mxu_dtype: None -> bf16 if any input is bf16 else fp32; pass jnp.bfloat16 to force
    bf16 MXU operands (fp32 accumulation kept) — recommended on v5e for fp32 models.
    vmem_limit_bytes: 48 MiB is safe on all generations (v7x: 64 MiB physical);
    raise to ~96 MiB on v5e/v6e together with larger q/kv tiles for big N.
    """
    del H, W, rel_pos_bias   # accepted by the PyTorch forward but unused
    B, N, C = x.shape
    three_D = w_qkv.shape[0]
    D = three_D // 3
    assert three_D == 3 * D
    assert D % num_heads == 0
    head_dim = D // num_heads
    assert w_proj.shape == (C, D) and b_proj.shape == (C,)
    scale = head_dim ** (-0.5)

    # MXU operand dtype: bf16 if any operand is bf16, or forced by the caller.
    if mxu_dtype is None:
        any_bf16 = any(jnp.dtype(a.dtype) == jnp.dtype(jnp.bfloat16)
                       for a in (x, w_qkv, w_proj))
        mm_dtype = jnp.dtype(jnp.bfloat16) if any_bf16 else jnp.dtype(jnp.float32)
    else:
        mm_dtype = jnp.dtype(mxu_dtype)

    # One-time parameter layout prep (parameter-load-time work in a real model):
    #  * bake the q scaling into the first D rows of the qkv weight,
    #  * transpose the proj weight to (D, C) so the kernel does (tq, D) @ (D, C).
    w_qkv_scaled = jnp.concatenate([w_qkv[:D] * scale, w_qkv[D:]], axis=0).astype(mm_dtype)
    w_proj_t = jnp.transpose(w_proj).astype(mm_dtype)    # (D, C)
    b_proj_r = b_proj.reshape(1, C).astype(jnp.float32)

    # Tiles. NOTE: for production performance C, D should be multiples of 128 and
    # tq/tkv multiples of 128; tiny shapes produce masked (vst.msk) stores.
    tq = q_tile or _pick_tile(N)
    tkv = kv_tile or _pick_tile(N)
    tm = row_tile or _pick_tile(N)
    assert N % tq == 0 and N % tkv == 0 and N % tm == 0
    assert tq % 8 == 0 and tkv % 8 == 0 and tm % 8 == 0
    n_q, n_kv, n_rows = N // tq, N // tkv, N // tm

    # ------------------- Kernel A: qkv projection ------------------- #
    qkv_kernel = functools.partial(_qkv_proj_kernel, num_heads=num_heads,
                                   head_dim=head_dim, mm_dtype=mm_dtype)
    qkv_shape = jax.ShapeDtypeStruct((B, num_heads, N, head_dim), mm_dtype)
    head_block = (1, num_heads, tm, head_dim)
    q_all, k_all, v_all = pl.pallas_call(
        qkv_kernel,
        out_shape=(qkv_shape, qkv_shape, qkv_shape),
        grid_spec=pltpu.PrefetchScalarGridSpec(
            num_scalar_prefetch=0,
            grid=(B, n_rows),
            in_specs=[
                pl.BlockSpec((1, tm, C), lambda b, r: (b, r, 0)),      # x (read once)
                pl.BlockSpec((three_D, C), lambda b, r: (0, 0)),        # resident weight
            ],
            out_specs=[
                pl.BlockSpec(head_block, lambda b, r: (b, 0, r, 0)),    # q
                pl.BlockSpec(head_block, lambda b, r: (b, 0, r, 0)),    # k
                pl.BlockSpec(head_block, lambda b, r: (b, 0, r, 0)),    # v
            ],
        ),
        compiler_params=pltpu.CompilerParams(
            dimension_semantics=("parallel", "parallel"),
            vmem_limit_bytes=vmem_limit_bytes,
        ),
    )(x, w_qkv_scaled)

    # --------------- Kernel B: flash attention + out-proj --------------- #
    attn_kernel = functools.partial(
        _flash_attn_proj_kernel, num_heads=num_heads, head_dim=head_dim,
        mm_dtype=mm_dtype, approx_recip=(mm_dtype == jnp.dtype(jnp.bfloat16)))
    out = pl.pallas_call(
        attn_kernel,
        out_shape=jax.ShapeDtypeStruct((B, N, C), x.dtype),
        grid_spec=pltpu.PrefetchScalarGridSpec(
            num_scalar_prefetch=0,
            grid=(B, n_q, n_kv),
            in_specs=[
                pl.BlockSpec((1, num_heads, tq, head_dim),
                             lambda b, qi, kv: (b, 0, qi, 0)),          # q (per q tile)
                pl.BlockSpec((1, num_heads, tkv, head_dim),
                             lambda b, qi, kv: (b, 0, kv, 0)),          # k
                pl.BlockSpec((1, num_heads, tkv, head_dim),
                             lambda b, qi, kv: (b, 0, kv, 0)),          # v
                pl.BlockSpec((D, C), lambda b, qi, kv: (0, 0)),         # resident Wproj^T
                pl.BlockSpec((1, C), lambda b, qi, kv: (0, 0)),         # resident bias
            ],
            out_specs=pl.BlockSpec((1, tq, C), lambda b, qi, kv: (b, qi, 0)),
            scratch_shapes=[
                pltpu.VMEM((num_heads, tq, 1), jnp.float32),            # running max
                pltpu.VMEM((num_heads, tq, 1), jnp.float32),            # running sum
                pltpu.VMEM((num_heads, tq, head_dim), jnp.float32),     # attn accumulator
                pltpu.VMEM((tq, D), mm_dtype),                          # head-concat buf
            ],
        ),
        compiler_params=pltpu.CompilerParams(
            # (B, n_q) are parallel -> keep B*n_q >= 2 so both v7x TCs get work.
            dimension_semantics=("parallel", "parallel", "arbitrary"),
            vmem_limit_bytes=vmem_limit_bytes,
        ),
    )(q_all, k_all, v_all, w_proj_t, b_proj_r)
    return out


def attention_reference(x, w_qkv, w_proj, b_proj, *, num_heads):
    """Pure-JAX reference mirroring the PyTorch forward."""
    B, N, C = x.shape
    D = w_qkv.shape[0] // 3
    head_dim = D // num_heads
    scale = head_dim ** (-0.5)

    qkv = jnp.einsum("bnc,dc->bnd", x, w_qkv)                       # (B, N, 3D)
    qkv = qkv.reshape(B, N, 3, num_heads, head_dim)
    qkv = jnp.transpose(qkv, (2, 0, 3, 1, 4))                       # (3, B, H, N, hd)
    q, k, v = qkv[0], qkv[1], qkv[2]
    q = q * scale
    attn = jnp.einsum("bhqd,bhkd->bhqk", q, k)
    attn = jax.nn.softmax(attn, axis=-1)
    out = jnp.einsum("bhqk,bhkd->bhqd", attn, v)
    out = jnp.transpose(out, (0, 2, 1, 3)).reshape(B, N, D)
    return jnp.einsum("bnd,cd->bnc", out, w_proj) + b_proj


if __name__ == "__main__":
    # Small but layout-friendly shapes: dim C = 128 (lane-dense stores),
    # num_heads = 4 -> head_dim = 32, tokens N = H*W = 8*8 = 64, batch B = 2.
    B, Hs, Ws = 2, 8, 8
    N = Hs * Ws
    C = 128
    num_heads = 4
    D = C  # all_head_dim == dim (attn_head_dim=None)

    key = jax.random.PRNGKey(0)
    k_x, k_wqkv, k_wproj, k_bproj = jax.random.split(key, 4)

    x = jax.random.normal(k_x, (B, N, C), dtype=jnp.float32)
    w_qkv = jax.random.normal(k_wqkv, (3 * D, C), dtype=jnp.float32) * 0.1   # Linear(dim, 3D, bias=False)
    w_proj = jax.random.normal(k_wproj, (C, D), dtype=jnp.float32) * 0.1     # Linear(D, dim)
    b_proj = jax.random.normal(k_bproj, (C,), dtype=jnp.float32) * 0.1

    ref = attention_reference(x, w_qkv, w_proj, b_proj, num_heads=num_heads)

    # fp32 MXU-operand path (exact parity); tiles chosen to exercise multi-tile grids.
    out = attention_forward(x, w_qkv, w_proj, b_proj, num_heads=num_heads, H=Hs, W=Ws,
                            q_tile=32, kv_tile=32, row_tile=32)
    out = jax.block_until_ready(out)
    assert out.shape == (B, N, C)
    err32 = float(jnp.max(jnp.abs(out - ref)))
    assert err32 < 2e-3, f"fp32 path mismatch vs pure-JAX reference (max abs err {err32})"

    # bf16 MXU-operand option (biggest win on v5e); fp32 accumulation kept everywhere.
    out_bf16 = attention_forward(x, w_qkv, w_proj, b_proj, num_heads=num_heads, H=Hs, W=Ws,
                                 q_tile=32, kv_tile=32, row_tile=32,
                                 mxu_dtype=jnp.bfloat16)
    out_bf16 = jax.block_until_ready(out_bf16)
    err16 = float(jnp.max(jnp.abs(out_bf16.astype(jnp.float32) - ref)))
    assert err16 < 0.15, f"bf16 path mismatch vs pure-JAX reference (max abs err {err16})"

    print("KERNEL_OK")
</pallas_src>

<mosaic_0001>
module attributes {stable_mosaic.version = 11 : i64} {
  func.func @_qkv_proj_kernel(%arg0: i32, %arg1: i32, %arg2: memref<1x32x128xf32, #tpu.memory_space<vmem>>, %arg3: memref<384x128xf32, #tpu.memory_space<vmem>>, %arg4: memref<1x4x32x32xf32, #tpu.memory_space<vmem>>, %arg5: memref<1x4x32x32xf32, #tpu.memory_space<vmem>>, %arg6: memref<1x4x32x32xf32, #tpu.memory_space<vmem>>) attributes {dimension_semantics = [#tpu.dimension_semantics<parallel>, #tpu.dimension_semantics<parallel>], iteration_bounds = array<i64: 2, 2>, scalar_prefetch = 0 : i64, scratch_operands = 0 : i64, tpu.core_type = #tpu.core_type<tc>, window_params = [{transform_indices = @transform_0, window_bounds = array<i64: 1, 32, 128>}, {pipeline_mode = #tpu.pipeline_mode<synchronous>, transform_indices = @transform_1, window_bounds = array<i64: 384, 128>}, {transform_indices = @transform_2, window_bounds = array<i64: 1, 4, 32, 32>}, {transform_indices = @transform_3, window_bounds = array<i64: 1, 4, 32, 32>}, {transform_indices = @transform_4, window_bounds = array<i64: 1, 4, 32, 32>}]} {
    %c0 = arith.constant 0 : index
    %c0_0 = arith.constant 0 : index
    %c0_1 = arith.constant 0 : index
    %0 = vector.load %arg2[%c0, %c0_0, %c0_1] : memref<1x32x128xf32, #tpu.memory_space<vmem>>, vector<1x32x128xf32>
    %1 = vector.shape_cast %0 : vector<1x32x128xf32> to vector<32x128xf32>
    %c0_2 = arith.constant 0 : index
    %c0_3 = arith.constant 0 : index
    %2 = vector.load %arg3[%c0_2, %c0_3] : memref<384x128xf32, #tpu.memory_space<vmem>>, vector<384x128xf32>
    %cst = arith.constant dense<0.000000e+00> : vector<32x384xf32>
    %3 = tpu.matmul %1, %2, %cst {dimension_numbers = #tpu.dot_dimension_numbers<[1], [1], [0], [0], [0, 0, 1, 0], [], []>} : vector<32x128xf32>, vector<384x128xf32>, vector<32x384xf32> -> vector<32x384xf32>
    %4 = vector.extract_strided_slice %3 {offsets = [0, 0], sizes = [32, 32], strides = [1, 1]} : vector<32x384xf32> to vector<32x32xf32>
    %c0_4 = arith.constant 0 : index
    %c0_5 = arith.constant 0 : index
    %c0_6 = arith.constant 0 : index
    %c0_7 = arith.constant 0 : index
    %5 = vector.load %arg4[%c0_4, %c0_5, %c0_6, %c0_7] : memref<1x4x32x32xf32, #tpu.memory_space<vmem>>, vector<1x1x32x32xf32>
    %6 = vector.shape_cast %5 : vector<1x1x32x32xf32> to vector<32x32xf32>
    %7 = vector.shape_cast %4 : vector<32x32xf32> to vector<1x1x32x32xf32>
    tpu.vector_store %arg4[%c0_4, %c0_5, %c0_6, %c0_7], %7 {strides = array<i32>} : memref<1x4x32x32xf32, #tpu.memory_space<vmem>>, vector<1x1x32x32xf32>,
    %8 = vector.extract_strided_slice %3 {offsets = [0, 128], sizes = [32, 32], strides = [1, 1]} : vector<32x384xf32> to vector<32x32xf32>
    %c0_8 = arith.constant 0 : index
    %c0_9 = arith.constant 0 : index
    %c0_10 = arith.constant 0 : index
    %c0_11 = arith.constant 0 : index
    %9 = vector.load %arg5[%c0_8, %c0_9, %c0_10, %c0_11] : memref<1x4x32x32xf32, #tpu.memory_space<vmem>>, vector<1x1x32x32xf32>
    %10 = vector.shape_cast %9 : vector<1x1x32x32xf32> to vector<32x32xf32>
    %11 = vector.shape_cast %8 : vector<32x32xf32> to vector<1x1x32x32xf32>
    tpu.vector_store %arg5[%c0_8, %c0_9, %c0_10, %c0_11], %11 {strides = array<i32>} : memref<1x4x32x32xf32, #tpu.memory_space<vmem>>, vector<1x1x32x32xf32>,
    %12 = vector.extract_strided_slice %3 {offsets = [0, 256], sizes = [32, 32], strides = [1, 1]} : vector<32x384xf32> to vector<32x32xf32>
    %c0_12 = arith.constant 0 : index
    %c0_13 = arith.constant 0 : index
    %c0_14 = arith.constant 0 : index
    %c0_15 = arith.constant 0 : index
    %13 = vector.load %arg6[%c0_12, %c0_13, %c0_14, %c0_15] : memref<1x4x32x32xf32, #tpu.memory_space<vmem>>, vector<1x1x32x32xf32>
    %14 = vector.shape_cast %13 : vector<1x1x32x32xf32> to vector<32x32xf32>
    %15 = vector.shape_cast %12 : vector<32x32xf32> to vector<1x1x32x32xf32>
    tpu.vector_store %arg6[%c0_12, %c0_13, %c0_14, %c0_15], %15 {strides = array<i32>} : memref<1x4x32x32xf32, #tpu.memory_space<vmem>>, vector<1x1x32x32xf32>,
    %16 = vector.extract_strided_slice %3 {offsets = [0, 32], sizes = [32, 32], strides = [1, 1]} : vector<32x384xf32> to vector<32x32xf32>
    %c0_16 = arith.constant 0 : index
    %c1 = arith.constant 1 : index
    %c0_17 = arith.constant 0 : index
    %c0_18 = arith.constant 0 : index
    %17 = vector.load %arg4[%c0_16, %c1, %c0_17, %c0_18] : memref<1x4x32x32xf32, #tpu.memory_space<vmem>>, vector<1x1x32x32xf32>
    %18 = vector.shape_cast %17 : vector<1x1x32x32xf32> to vector<32x32xf32>
    %19 = vector.shape_cast %16 : vector<32x32xf32> to vector<1x1x32x32xf32>
    tpu.vector_store %arg4[%c0_16, %c1, %c0_17, %c0_18], %19 {strides = array<i32>} : memref<1x4x32x32xf32, #tpu.memory_space<vmem>>, vector<1x1x32x32xf32>,
    %20 = vector.extract_strided_slice %3 {offsets = [0, 160], sizes = [32, 32], strides = [1, 1]} : vector<32x384xf32> to vector<32x32xf32>
    %c0_19 = arith.constant 0 : index
    %c1_20 = arith.constant 1 : index
    %c0_21 = arith.constant 0 : index
    %c0_22 = arith.constant 0 : index
    %21 = vector.load %arg5[%c0_19, %c1_20, %c0_21, %c0_22] : memref<1x4x32x32xf32, #tpu.memory_space<vmem>>, vector<1x1x32x32xf32>
    %22 = vector.shape_cast %21 : vector<1x1x32x32xf32> to vector<32x32xf32>
    %23 = vector.shape_cast %20 : vector<32x32xf32> to vector<1x1x32x32xf32>
    tpu.vector_store %arg5[%c0_19, %c1_20, %c0_21, %c0_22], %23 {strides = array<i32>} : memref<1x4x32x32xf32, #tpu.memory_space<vmem>>, vector<1x1x32x32xf32>,
    %24 = vector.extract_strided_slice %3 {offsets = [0, 288], sizes = [32, 32], strides = [1, 1]} : vector<32x384xf32> to vector<32x32xf32>
    %c0_23 = arith.constant 0 : index
    %c1_24 = arith.constant 1 : index
    %c0_25 = arith.constant 0 : index
    %c0_26 = arith.constant 0 : index
    %25 = vector.load %arg6[%c0_23, %c1_24, %c0_25, %c0_26] : memref<1x4x32x32xf32, #tpu.memory_space<vmem>>, vector<1x1x32x32xf32>
    %26 = vector.shape_cast %25 : vector<1x1x32x32xf32> to vector<32x32xf32>
    %27 = vector.shape_cast %24 : vector<32x32xf32> to vector<1x1x32x32xf32>
    tpu.vector_store %arg6[%c0_23, %c1_24, %c0_25, %c0_26], %27 {strides = array<i32>} : memref<1x4x32x32xf32, #tpu.memory_space<vmem>>, vector<1x1x32x32xf32>,
    %28 = vector.extract_strided_slice %3 {offsets = [0, 64], sizes = [32, 32], strides = [1, 1]} : vector<32x384xf32> to vector<32x32xf32>
    %c0_27 = arith.constant 0 : index
    %c2 = arith.constant 2 : index
    %c0_28 = arith.constant 0 : index
    %c0_29 = arith.constant 0 : index
    %29 = vector.load %arg4[%c0_27, %c2, %c0_28, %c0_29] : memref<1x4x32x32xf32, #tpu.memory_space<vmem>>, vector<1x1x32x32xf32>
    %30 = vector.shape_cast %29 : vector<1x1x32x32xf32> to vector<32x32xf32>
    %31 = vector.shape_cast %28 : vector<32x32xf32> to vector<1x1x32x32xf32>
    tpu.vector_store %arg4[%c0_27, %c2, %c0_28, %c0_29], %31 {strides = array<i32>} : memref<1x4x32x32xf32, #tpu.memory_space<vmem>>, vector<1x1x32x32xf32>,
    %32 = vector.extract_strided_slice %3 {offsets = [0, 192], sizes = [32, 32], strides = [1, 1]} : vector<32x384xf32> to vector<32x32xf32>
    %c0_30 = arith.constant 0 : index
    %c2_31 = arith.constant 2 : index
    %c0_32 = arith.constant 0 : index
    %c0_33 = arith.constant 0 : index
    %33 = vector.load %arg5[%c0_30, %c2_31, %c0_32, %c0_33] : memref<1x4x32x32xf32, #tpu.memory_space<vmem>>, vector<1x1x32x32xf32>
    %34 = vector.shape_cast %33 : vector<1x1x32x32xf32> to vector<32x32xf32>
    %35 = vector.shape_cast %32 : vector<32x32xf32> to vector<1x1x32x32xf32>
    tpu.vector_store %arg5[%c0_30, %c2_31, %c0_32, %c0_33], %35 {strides = array<i32>} : memref<1x4x32x32xf32, #tpu.memory_space<vmem>>, vector<1x1x32x32xf32>,
    %36 = vector.extract_strided_slice %3 {offsets = [0, 320], sizes = [32, 32], strides = [1, 1]} : vector<32x384xf32> to vector<32x32xf32>
    %c0_34 = arith.constant 0 : index
    %c2_35 = arith.constant 2 : index
    %c0_36 = arith.constant 0 : index
    %c0_37 = arith.constant 0 : index
    %37 = vector.load %arg6[%c0_34, %c2_35, %c0_36, %c0_37] : memref<1x4x32x32xf32, #tpu.memory_space<vmem>>, vector<1x1x32x32xf32>
    %38 = vector.shape_cast %37 : vector<1x1x32x32xf32> to vector<32x32xf32>
    %39 = vector.shape_cast %36 : vector<32x32xf32> to vector<1x1x32x32xf32>
    tpu.vector_store %arg6[%c0_34, %c2_35, %c0_36, %c0_37], %39 {strides = array<i32>} : memref<1x4x32x32xf32, #tpu.memory_space<vmem>>, vector<1x1x32x32xf32>,
    %40 = vector.extract_strided_slice %3 {offsets = [0, 96], sizes = [32, 32], strides = [1, 1]} : vector<32x384xf32> to vector<32x32xf32>
    %c0_38 = arith.constant 0 : index
    %c3 = arith.constant 3 : index
    %c0_39 = arith.constant 0 : index
    %c0_40 = arith.constant 0 : index
    %41 = vector.load %arg4[%c0_38, %c3, %c0_39, %c0_40] : memref<1x4x32x32xf32, #tpu.memory_space<vmem>>, vector<1x1x32x32xf32>
    %42 = vector.shape_cast %41 : vector<1x1x32x32xf32> to vector<32x32xf32>
    %43 = vector.shape_cast %40 : vector<32x32xf32> to vector<1x1x32x32xf32>
    tpu.vector_store %arg4[%c0_38, %c3, %c0_39, %c0_40], %43 {strides = array<i32>} : memref<1x4x32x32xf32, #tpu.memory_space<vmem>>, vector<1x1x32x32xf32>,
    %44 = vector.extract_strided_slice %3 {offsets = [0, 224], sizes = [32, 32], strides = [1, 1]} : vector<32x384xf32> to vector<32x32xf32>
    %c0_41 = arith.constant 0 : index
    %c3_42 = arith.constant 3 : index
    %c0_43 = arith.constant 0 : index
    %c0_44 = arith.constant 0 : index
    %45 = vector.load %arg5[%c0_41, %c3_42, %c0_43, %c0_44] : memref<1x4x32x32xf32, #tpu.memory_space<vmem>>, vector<1x1x32x32xf32>
    %46 = vector.shape_cast %45 : vector<1x1x32x32xf32> to vector<32x32xf32>
    %47 = vector.shape_cast %44 : vector<32x32xf32> to vector<1x1x32x32xf32>
    tpu.vector_store %arg5[%c0_41, %c3_42, %c0_43, %c0_44], %47 {strides = array<i32>} : memref<1x4x32x32xf32, #tpu.memory_space<vmem>>, vector<1x1x32x32xf32>,
    %48 = vector.extract_strided_slice %3 {offsets = [0, 352], sizes = [32, 32], strides = [1, 1]} : vector<32x384xf32> to vector<32x32xf32>
    %c0_45 = arith.constant 0 : index
    %c3_46 = arith.constant 3 : index
    %c0_47 = arith.constant 0 : index
    %c0_48 = arith.constant 0 : index
    %49 = vector.load %arg6[%c0_45, %c3_46, %c0_47, %c0_48] : memref<1x4x32x32xf32, #tpu.memory_space<vmem>>, vector<1x1x32x32xf32>
    %50 = vector.shape_cast %49 : vector<1x1x32x32xf32> to vector<32x32xf32>
    %51 = vector.shape_cast %48 : vector<32x32xf32> to vector<1x1x32x32xf32>
    tpu.vector_store %arg6[%c0_45, %c3_46, %c0_47, %c0_48], %51 {strides = array<i32>} : memref<1x4x32x32xf32, #tpu.memory_space<vmem>>, vector<1x1x32x32xf32>,
    return
  }
  func.func @transform_0(%arg0: i32, %arg1: i32) -> (i32, i32, i32) {
    %c0_i32 = arith.constant 0 : i32
    %c0_i32_0 = arith.constant 0 : i32
    return %arg0, %arg1, %c0_i32 : i32, i32, i32
  }
  func.func @transform_1(%arg0: i32, %arg1: i32) -> (i32, i32) {
    %c0_i32 = arith.constant 0 : i32
    %c0_i32_0 = arith.constant 0 : i32
    %c0_i32_1 = arith.constant 0 : i32
    return %c0_i32, %c0_i32_0 : i32, i32
  }
  func.func @transform_2(%arg0: i32, %arg1: i32) -> (i32, i32, i32, i32) {
    %c0_i32 = arith.constant 0 : i32
    %c0_i32_0 = arith.constant 0 : i32
    %c0_i32_1 = arith.constant 0 : i32
    return %arg0, %c0_i32, %arg1, %c0_i32_0 : i32, i32, i32, i32
  }
  func.func @transform_3(%arg0: i32, %arg1: i32) -> (i32, i32, i32, i32) {
    %c0_i32 = arith.constant 0 : i32
    %c0_i32_0 = arith.constant 0 : i32
    %c0_i32_1 = arith.constant 0 : i32
    return %arg0, %c0_i32, %arg1, %c0_i32_0 : i32, i32, i32, i32
  }
  func.func @transform_4(%arg0: i32, %arg1: i32) -> (i32, i32, i32, i32) {
    %c0_i32 = arith.constant 0 : i32
    %c0_i32_0 = arith.constant 0 : i32
    %c0_i32_1 = arith.constant 0 : i32
    return %arg0, %c0_i32, %arg1, %c0_i32_0 : i32, i32, i32, i32
  }
}

</mosaic_0001>

<bundles_post_ra>
// kernel: tpu_custom_call.1
= control target key start
LH: loop header
LB: loop body
LE: loop exit
PB: predicated region body
PF: predicated region fallthrough
CT: control target
= control target key end

     0   :  { %s2032_s0 = inlined_call_operand.hbm [shape: f32[2,64,128], index: 0, kind: input, shape index: {}]   ;;  %s2033_s1 = inlined_call_operand.hbm [shape: f32[384,128], index: 1, kind: input, shape index: {}]   ;;  %s2034_s2 = inlined_call_operand.vmem [shape: f32[2,4,64,32], index: 2, kind: output, shape index: {0}]   ;;  %s2035_s3 = inlined_call_operand.vmem [shape: f32[2,4,64,32], index: 3, kind: output, shape index: {1}]   ;;  %s2036_s4 = inlined_call_operand.vmem [shape: f32[2,4,64,32], index: 4, kind: output, shape index: {2}]  }
   0x1   :  { %2044 = sst [smem:[#allocation12_spill]] %s2033_s1 }
   0x2   :  { %2045 = sst [smem:[#allocation13_spill]] %s2035_s3 }
   0x3   :  { %2046 = sst [smem:[#allocation14_spill]] %s2036_s4 }
   0x4   :  { %10 = vsyncpa [#allocation3], 0 }
   0x5   :  { %12 = vsyncpa [#allocation3 + $0x1], 0 }
   0x6   :  { %13 = vsyncpa [#allocation5], 0  ;;  %s1609_s15 = smov 0   ;;  %s1611_s16 = smov 0  }
   0x7   :  { %s1613_s17 = smov 0   ;;  %s1615_s18 = smov 0  }
   0x8   :  { %s1617_s19 = smov 0   ;;  %s1619_s20 = smov 0  }
   0x9   :  { %s1621_s21 = smov 0   ;;  %s1623_s22 = smov 0  }
   0xa LB: > { %s1133_s23 = sadd.s32 4294967295, %s1575_s22   ;;  %p53_p0 = scmp.ne.s32.totalorder %s1551_s16, %s1547_s15  ;;  %s1575_s22 = sphi %s1623_s22, %s19_s22   ;;  %s1571_s21 = sphi %s1621_s21, %s2072_s21   ;;  %s1567_s20 = sphi %s1619_s20, %s2071_s20   ;;  %s1563_s19 = sphi %s1617_s19, %s2070_s19   ;;  %s1559_s18 = sphi %s1615_s18, %s2069_s18   ;;  %s1555_s17 = sphi %s1613_s17, %s2068_s17   ;;  %s1551_s16 = sphi %s1611_s16, %s2067_s16   ;;  %s1547_s15 = sphi %s1609_s15, %s2066_s15  }
   0xb   : > { %p1649_p1 = scmp.eq.s32.totalorder %s1133_s23, 0  ;;  %p1653_p2 = scmp.eq.s32.totalorder %s1133_s23, 3 }
   0xc   : > { %p1135_p3 = scmp.ge.s32.totalorder %s1575_s22, 1  ;;  %p169_p4 = scmp.lt.s32.totalorder %s1575_s22, 5 }
   0xd   : > { %s2047_s24 = scalar_select %p1649_p1, 1, 0 }
   0xe   : > { %s2048_s25 = scalar_select %p1653_p2, 1, 0 }
   0xf   : > { %p1661_p5 = por %p1649_p1, %p53_p0  ;;  %p1665_p6 = pnand %p1135_p3, %p169_p4 }
  0x10   : > { %s1577_s28 = smov [#allocation4]   ;;  %s2052_s1 = sld [smem:[#allocation12_spill]] }
  0x11   : > { %s2049_s26 = scalar_select %p1661_p5, 1, 0 }
  0x12   : > { %s2050_s27 = scalar_select %p1665_p6, 1, 0 }
  0x13   : > { %s181_s29 = sshll.u32 %s1577_s28, 4  ;;  %p1366_p7 = pneg %p1665_p6  ;;  %s182_s29 = int_to_ptr.vmem [resolvable:$true] %s181_s29 }
  0x15   : > { %p1673_p8 = pnand %p1366_p7, %p1649_p1 }
  0x16   : > { %s1447_s7 = scalar_lea.hbm %s2052_s1, 6144 }
  0x17   : > { %p1448_p9 = scmp.ne.s32.totalorder %s2052_s1, %s1447_s7  ;;  %p1449_p10 = pneg %p1673_p8 }
  0x18   : > { %p1454_p13 = scmp.lt.u32.totalorder %s1447_s7, %s2052_s1 }
  0x19   : > { %p1450_p11 = pnand %p1449_p10, %p1448_p9 }
  0x1b   : > { %p1451_p12 = pneg %p1450_p11 }
  0x1d   : > { %p1456_p0 = pnand %p1454_p13, %p1451_p12 }
  0x1f   : > { %1459 = shalt.err (!%p1456_p0)
}
  0x20   : > { %s1460_s12 = scalar_lea.vmem %s182_s29, 6144  ;;  %p1468_p1 = scmp.lt.s32.totalorder %s182_s29, %s182_s29 }
  0x21   : > { %p1461_p3 = scmp.ne.s32.totalorder %s182_s29, %s1460_s12  ;;  %p1469_p5 = scmp.lt.s32.totalorder %s1460_s12, %s1460_s12 }
  0x23   : > { %p1463_p4 = pnand %p1461_p3, %p1449_p10  ;;  %p1470_p6 = por %p1469_p5, %p1468_p1 }
  0x25   : > { %p1464_p7 = pneg %p1463_p4 }
  0x27   : > { %p1471_p2 = pnand %p1470_p6, %p1464_p7 }
  0x29   : > { %1474 = shalt.err (!%p1471_p2)
}
  0x2a   : > { %s2041_s13 = smov 128   ;;  %s2042_s14 = smov 8  }
  0x2b   : > { %1369 = dma.hbm_to_vmem [thread:$0]  (!%p1673_p8), %s2052_s1, 6144, %s182_s29, [#allocation5], %s2041_s13, %s2041_s13, %s2042_s14  }
  0x2c   : > { %s28_s28 = sadd.s32 1, %s1567_s20  ;;  %s31_s5 = sadd.s32 1, %s1571_s21 }
  0x2d   : > { %p29_p1 = scmp.ge.s32.totalorder %s28_s28, 2  ;;  %s40_s6 = sadd.s32 1, %s1555_s17 }
  0x2e   : > { %p47_p2 = scmp.ne.s32.totalorder %s1555_s17, %s1551_s16  ;;  %p48_p5 = scmp.eq.s32.totalorder %s1575_s22, 0 }
  0x2f   : > { %s2074_s28 = smov (%p29_p1, %s28_s28), 0  ;;  %s2076_s5 = smov (!%p29_p1, %s31_s5), %s1571_s21 }
  0x30   : > { %2053 = sst [smem:[#allocation11_spill]] %s2074_s28  ;;  %s36_s30 = ssub.s32 %s1567_s20, %s2074_s28 }
  0x31   : > { %p1707_p6 = por %p48_p5, %p47_p2  ;;  %p33_p8 = scmp.ge.s32.totalorder %s2076_s5, 2 }
  0x32   : > { %p2055_p9 = scmp.ne.s32.totalorder %s2048_s25, 0  ;;  %p1375_p11 = scmp.lt.s32.totalorder %s1575_s22, 4 }
  0x33   : > { %s195_s8 = sand.u32 1, %s1555_s17   ;;  %s2078_s5 = smov (%p33_p8, %s2076_s5), 0 }
  0x34   : > { %p1713_p10 = por %p2055_p9, %p47_p2  ;;  %s1138_s9 = sshll.u32 %s195_s8, 5 }
  0x35   : > { %s35_s10 = ssub.s32 %s1571_s21, %s2078_s5  ;;  %s1139_s12 = sshll.u32 %s1567_s20, 2 }
  0x36   : > { %s37_s11 = sor.u32 %s36_s30, %s35_s10  ;;  %s1140_s15 = sshll.u32 %s1571_s21, 3 }
  0x37   : > { %p38_p12 = scmp.eq.s32.totalorder %s37_s11, 0  ;;  %s205_s23 = sadd.s32 %s1140_s15, %s1139_s12 }
  0x38   : > { %s199_s13 = scalar_lea.vmem [#allocation2], %s1138_s9  ;;  %s1141_s1 = sshll.u32 %s205_s23, 7 }
  0x39   : > { %s208_s25 = sshll.u32 %s199_s13, 4  ;;  %s1733_s3 = scalar_lea.hbm %s2032_s0, %s1141_s1  ;;  %s1728_s25 = int_to_ptr.vmem [resolvable:$true] %s208_s25 }
  0x3a   : > { %s1726_s14 = scalar_select %p38_p12, %s1555_s17, %s40_s6  }
  0x3b   : > { %p1739_p13 = pnand %p1375_p11, %p1707_p6  ;;  %s1743_s13 = scalar_lea.sflag [#allocation3], %s195_s8 }
  0x3c   : > { %s1475_s6 = scalar_lea.hbm %s1733_s3, 512  ;;  %s1480_s28 = scalar_lea.hbm %s2032_s0, 2048 }
  0x3d   : > { %p1476_p0 = scmp.ne.s32.totalorder %s1733_s3, %s1475_s6  ;;  %p1477_p3 = pneg %p1739_p13 }
  0x3e   : > { %p1481_p1 = scmp.lt.u32.totalorder %s1733_s3, %s2032_s0  ;;  %p1482_p2 = scmp.lt.u32.totalorder %s1480_s28, %s1475_s6 }
  0x3f   : > { %p1478_p4 = pnand %p1477_p3, %p1476_p0  ;;  %p1484_p6 = scmp.lt.u32.totalorder %s1475_s6, %s1733_s3 }
  0x40   : > { %p1483_p5 = por %p1482_p2, %p1481_p1 }
  0x41   : > { %p1479_p7 = pneg %p1478_p4 }
  0x42   : > { %p1485_p8 = por %p1484_p6, %p1483_p5 }
  0x44   : > { %p1486_p9 = pnand %p1485_p8, %p1479_p7 }
  0x46   : > { %1489 = shalt.err (!%p1486_p9)
}
  0x47   : > { %s1490_s8 = scalar_lea.vmem %s1728_s25, 512  ;;  %s1580_s10 = smov [#allocation2]  }
  0x48   : > { %p1491_p11 = scmp.ne.s32.totalorder %s1728_s25, %s1490_s8  ;;  %s1495_s11 = sshll.u32 %s1580_s10, 4  ;;  %s1496_s11 = int_to_ptr.vmem [resolvable:$false] %s1495_s11 }
  0x49   : > { %s1497_s12 = scalar_lea.vmem %s1496_s11, 1024  ;;  %p1498_p4 = scmp.lt.s32.totalorder %s1728_s25, %s1496_s11 }
  0x4a   : > { %p1493_p12 = pnand %p1491_p11, %p1477_p3  ;;  %p1499_p1 = scmp.lt.s32.totalorder %s1497_s12, %s1490_s8 }
  0x4c   : > { %p1494_p0 = pneg %p1493_p12  ;;  %p1500_p2 = por %p1499_p1, %p1498_p4 }
  0x4e   : > { %p1501_p5 = pnand %p1500_p2, %p1494_p0 }
  0x50   : > { %1504 = shalt.err (!%p1501_p5)
}
  0x51   : > { %s2058_s15 = smov 8   ;;  %s2059_s23 = smov 128  }
  0x52   : > { %1373 = dma.hbm_to_vmem [thread:$0]  (!%p1739_p13), %s1733_s3, 512, %s1728_s25, %s1743_s13, %s2059_s23, %s2059_s23, %s2058_s15  }
  0x53   : > { %p2060_p3 = scmp.ne.s32.totalorder %s2050_s27, 0 }
  0x54   : > { %s1777_s6 = sand.u32 (!%p2060_p3), 1, %s1551_s16   ;;  %p2061_p7 = scmp.ne.s32.totalorder (!%p2060_p3), %s2049_s26, 0 }
  0x55   : > { %220 = sbr.rel (%p2060_p3) target bundleno = 592 (0x250), region = 28  ;;  %s1143_s1 = sshll.u32 (!%p2060_p3), %s1777_s6, 5 }
  0x56   : > { %s223_s4 = scalar_lea.sflag (!%p2060_p3), [#allocation3], %s1777_s6  ;;  %s1781_s28 = scalar_lea.vmem (!%p2060_p3), [#allocation2], %s1143_s1 }
  0x5c   : > { %1538 = dma.done.wait (%p2061_p7), %s223_s4, 512  }
  0x5d   : > { %1540 = vsyncadd (%p2061_p7), %s223_s4, 4294966784  ;;  %p2062_p13 = scmp.ne.s32.totalorder %s2047_s24, 0 }
  0x5f   : > { %1542 = dma.done.wait (%p2062_p13), [#allocation5], 6144  }
  0x60   : > { %1544 = vsyncadd (%p2062_p13), [#allocation5], 4294961152  ;;  %v286_v0 = vld [vmem:[#allocation4 + $0x80] sm:$0xff]  ;;  %v287_v1 = vld [vmem:[#allocation4 + $0x88] sm:$0xff]  ;;  %s1145_s3 = sshll.u32 %s1777_s6, 7  ;;  %vm492_vm0 = vcmask 261120  }
  0x61   : > { %v302_v2 = vld [vmem:[#allocation4 + $0x100] sm:$0xff]  ;;  %v1296_v3 = vpack.c.bf16 %v287_v1, %v286_v0  ;;  %v303_v4 = vld [vmem:[#allocation4 + $0x108] sm:$0xff]  ;;  %v288_v9 = vld [vmem:[#allocation4 + $0x90] sm:$0xff]  ;;  %s1801_s24 = scalar_lea.vmem [#allocation6], %s1145_s3  ;;  %s1581_s26 = smov 96  }
  0x62   : > { %v270_v5 = vld [vmem:[#allocation4] sm:$0xff]  ;;  %v271_v6 = vld [vmem:[#allocation4 + $0x8] sm:$0xff]  ;;  %v1328_v7 = vpack.c.bf16 %v303_v4, %v302_v2  ;;  %v289_v10 = vld [vmem:[#allocation4 + $0x98] sm:$0xff]  ;;  %s1806_s27 = scalar_lea.vmem [#allocation8], %s1145_s3  ;;  %s1811_s25 = scalar_lea.vmem [#allocation7], %s1145_s3 }
  0x63   : > { %v1298_v8 = vpack.c.bf16 %v271_v6, %v270_v5  ;;  %v304_v11 = vld [vmem:[#allocation4 + $0x110] sm:$0xff]  ;;  %1297 = vmatprep.subr.bf16.mxu0 %v1296_v3  ;;  %v1300_v12 = vpack.c.bf16 %v289_v10, %v288_v9  ;;  %v305_v13 = vld [vmem:[#allocation4 + $0x118] sm:$0xff]  ;;  %v290_v17 = vld [vmem:[#allocation4 + $0xa0] sm:$0xff]  ;;  %s1582_s30 = smov 64   ;;  %s1583_s13 = smov 32  }
  0x64   : > { %1329 = vmatprep.subr.bf16.mxu1 %v1328_v7  ;;  %v1332_v14 = vpack.c.bf16 %v305_v13, %v304_v11  ;;  %v272_v15 = vld [vmem:[#allocation4 + $0x10] sm:$0xff]  ;;  %v273_v16 = vld [vmem:[#allocation4 + $0x18] sm:$0xff]  ;;  %v291_v18 = vld [vmem:[#allocation4 + $0xa8] sm:$0xff]  ;;  %s1187_s7 = sshll.u32 (%p1713_p10), %s1559_s18, 2  ;;  %s1188_s9 = sshll.u32 (%p1713_p10), %s1563_s19, 5 }
  0x65   : > { %1299 = vmatpush3.bf16.xpose.msra.mxu0 %v1298_v8  ;;  %1331 = vmatpush3.bf16.xpose.msra.mxu1 %v1328_v7  ;;  %v306_v19 = vld [vmem:[#allocation4 + $0x120] sm:$0xff]  ;;  %v307_v20 = vld [vmem:[#allocation4 + $0x128] sm:$0xff]  ;;  %v1302_v21 = vpack.c.bf16 %v273_v16, %v272_v15  ;;  %v1304_v22 = vpack.c.bf16 %v291_v18, %v290_v17  ;;  %v292_v26 = vld [vmem:[#allocation4 + $0xb0] sm:$0xff]  ;;  %s687_s8 = sadd.s32 (%p1713_p10), %s1188_s9, %s1187_s7 }
  0x66   : > { %1301 = vmatprep.subr.bf16.mxu0 %v1300_v12  ;;  %1333 = vmatprep.subr.bf16.mxu1 %v1332_v14  ;;  %v1336_v23 = vpack.c.bf16 %v307_v20, %v306_v19  ;;  %v274_v24 = vld [vmem:[#allocation4 + $0x20] sm:$0xff]  ;;  %v275_v25 = vld [vmem:[#allocation4 + $0x28] sm:$0xff]  ;;  %v293_v27 = vld [vmem:[#allocation4 + $0xb8] sm:$0xff]  ;;  %s1189_s10 = sshll.u32 (%p1713_p10), %s687_s8, 3 }
  0x67   : > { %v308_v28 = vld [vmem:[#allocation4 + $0x130] sm:$0xff]  ;;  %v309_v29 = vld [vmem:[#allocation4 + $0x138] sm:$0xff]  ;;  %v1306_v30 = vpack.c.bf16 %v275_v25, %v274_v24  ;;  %v1792_v31 = vld [vmem:[%s1781_s28] sm:$0xff]  ;;  %v1308_v32 = vpack.c.bf16 %v293_v27, %v292_v26  ;;  %s689_s15 = scalar_lea.vmem (%p1713_p10), %s2034_s2, %s1189_s10 }
  0x68   : > { %1230 = vmatprep.mubr.f32.mxu0 %v1792_v31  ;;  %1290 = vmatprep.mubr.f32.mxu1 %v1792_v31  ;;  %v1340_v33 = vpack.c.bf16 %v309_v29, %v308_v28  ;;  %v276_v34 = vld [vmem:[#allocation4 + $0x30] sm:$0xff]  ;;  %v277_v35 = vld [vmem:[#allocation4 + $0x38] sm:$0xff]  ;;  %v294_v36 = vld [vmem:[#allocation4 + $0xc0] sm:$0xff] }
  0x69   : > { %v295_v37 = vld [vmem:[#allocation4 + $0xc8] sm:$0xff]  ;;  %v310_v38 = vld [vmem:[#allocation4 + $0x140] sm:$0xff]  ;;  %v1310_v40 = vpack.c.bf16 %v277_v35, %v276_v34  ;;  %v296_v45 = vld [vmem:[#allocation4 + $0xd0] sm:$0xff] }
  0x6a   : > { %v311_v39 = vld [vmem:[#allocation4 + $0x148] sm:$0xff]  ;;  %v1312_v41 = vpack.c.bf16 %v295_v37, %v294_v36  ;;  %v278_v43 = vld [vmem:[#allocation4 + $0x40] sm:$0xff]  ;;  %v297_v46 = vld [vmem:[#allocation4 + $0xd8] sm:$0xff] }
  0x6b   : > { %v1344_v42 = vpack.c.bf16 %v311_v39, %v310_v38  ;;  %v279_v44 = vld [vmem:[#allocation4 + $0x48] sm:$0xff]  ;;  %v312_v47 = vld [vmem:[#allocation4 + $0x150] sm:$0xff]  ;;  %v313_v48 = vld [vmem:[#allocation4 + $0x158] sm:$0xff]  ;;  %v1316_v50 = vpack.c.bf16 %v297_v46, %v296_v45 }
  0x6c   : > { %v1314_v49 = vpack.c.bf16 %v279_v44, %v278_v43  ;;  %v1348_v51 = vpack.c.bf16 %v313_v48, %v312_v47  ;;  %v280_v52 = vld [vmem:[#allocation4 + $0x50] sm:$0xff]  ;;  %v281_v53 = vld [vmem:[#allocation4 + $0x58] sm:$0xff]  ;;  %v298_v54 = vld [vmem:[#allocation4 + $0xe0] sm:$0xff] }
  0x6d   : > { %1303 = vmatpush3.bf16.xpose.msra.mxu0 %v1302_v21  ;;  %1335 = vmatpush3.bf16.xpose.msra.mxu1 %v1332_v14  ;;  %v299_v55 = vld [vmem:[#allocation4 + $0xe8] sm:$0xff]  ;;  %v314_v56 = vld [vmem:[#allocation4 + $0x160] sm:$0xff]  ;;  %v1318_v58 = vpack.c.bf16 %v281_v53, %v280_v52  ;;  %v300_v63 = vld [vmem:[#allocation4 + $0xf0] sm:$0xff] }
  0x6e   : > { %1305 = vmatprep.subr.bf16.mxu0 %v1304_v22  ;;  %1337 = vmatprep.subr.bf16.mxu1 %v1336_v23  ;;  %v315_v57 = vld [vmem:[#allocation4 + $0x168] sm:$0xff]  ;;  %v1320_v59 = vpack.c.bf16 %v299_v55, %v298_v54  ;;  %v282_v61 = vld [vmem:[#allocation4 + $0x60] sm:$0xff]  ;;  %v301_v0 = vld [vmem:[#allocation4 + $0xf8] sm:$0xff] }
  0x6f   : > { %v1352_v60 = vpack.c.bf16 %v315_v57, %v314_v56  ;;  %v283_v62 = vld [vmem:[#allocation4 + $0x68] sm:$0xff]  ;;  %v316_v1 = vld [vmem:[#allocation4 + $0x170] sm:$0xff]  ;;  %v317_v2 = vld [vmem:[#allocation4 + $0x178] sm:$0xff]  ;;  %v1324_v4 = vpack.c.bf16 %v301_v0, %v300_v63 }
  0x70   : > { %v1322_v3 = vpack.c.bf16 %v283_v62, %v282_v61  ;;  %v1356_v5 = vpack.c.bf16 %v317_v2, %v316_v1  ;;  %v284_v6 = vld [vmem:[#allocation4 + $0x70] sm:$0xff]  ;;  %v285_v7 = vld [vmem:[#allocation4 + $0x78] sm:$0xff]  ;;  %v267_v9 = vld [vmem:[%s1781_s28 + $0x8] sm:$0xff] }
  0x71   : > { %v1326_v8 = vpack.c.bf16 %v285_v7, %v284_v6  ;;  %v268_v10 = vld [vmem:[%s1781_s28 + $0x10] sm:$0xff]  ;;  %v269_v11 = vld [vmem:[%s1781_s28 + $0x18] sm:$0xff] }
  0x75   : > { %1307 = vmatpush3.bf16.xpose.msra.mxu0 %v1306_v30  ;;  %1339 = vmatpush3.bf16.xpose.msra.mxu1 %v1336_v23 }
  0x76   : > { %1309 = vmatprep.subr.bf16.mxu0 %v1308_v32  ;;  %1341 = vmatprep.subr.bf16.mxu1 %v1340_v33 }
  0x7d   : > { %1311 = vmatpush3.bf16.xpose.msra.mxu0 %v1310_v40  ;;  %1343 = vmatpush3.bf16.xpose.msra.mxu1 %v1340_v33 }
  0x7e   : > { %1313 = vmatprep.subr.bf16.mxu0 %v1312_v41  ;;  %1345 = vmatprep.subr.bf16.mxu1 %v1344_v42 }
  0x85   : > { %1315 = vmatpush3.bf16.xpose.msra.mxu0 %v1314_v49  ;;  %1347 = vmatpush3.bf16.xpose.msra.mxu1 %v1344_v42 }
  0x86   : > { %1317 = vmatprep.subr.bf16.mxu0 %v1316_v50  ;;  %1349 = vmatprep.subr.bf16.mxu1 %v1348_v51 }
  0x8d   : > { %1319 = vmatpush3.bf16.xpose.msra.mxu0 %v1318_v58  ;;  %1351 = vmatpush3.bf16.xpose.msra.mxu1 %v1348_v51 }
  0x8e   : > { %1321 = vmatprep.subr.bf16.mxu0 %v1320_v59  ;;  %1353 = vmatprep.subr.bf16.mxu1 %v1352_v60 }
  0x95   : > { %1323 = vmatpush3.bf16.xpose.msra.mxu0 %v1322_v3  ;;  %1355 = vmatpush3.bf16.xpose.msra.mxu1 %v1352_v60 }
  0x96   : > { %1325 = vmatprep.subr.bf16.mxu0 %v1324_v4  ;;  %1357 = vmatprep.subr.bf16.mxu1 %v1356_v5 }
  0x9d   : > { %1327 = vmatpush3.bf16.xpose.msra.mxu0 %v1326_v8  ;;  %1359 = vmatpush3.bf16.xpose.msra.mxu1 %v1356_v5 }
  0xa4   : > { %1231 = vmatmul.mubr.f32.vlgmr.msra.gmra.mrb[0].mxu0 %v1792_v31  ;;  %1291 = vmatmul.mubr.f32.vlgmr.msra.gmra.mrb[0].mxu1 %v267_v9 }
  0xa5   : > { %1232 = vmatprep.mubr.f32.mxu0 %v267_v9  ;;  %1293 = vmatprep.mubr.f32.mxu1 %v268_v10 }
  0xa8   : > { %1233 = vmatmul.mubr.f32.gmra.mrb[2].mxu0 %v267_v9  ;;  %1294 = vmatmul.mubr.f32.gmra.mrb[2].mxu1 %v269_v11 }
  0xa9   : > { %1234 = vmatprep.mubr.f32.mxu0 %v268_v10 }
  0xac   : > { %1235 = vmatmul.mubr.f32.gmra.mrb[4].mxu0 %v268_v10 }
  0xad   : > { %1236 = vmatprep.mubr.f32.mxu0 %v269_v11 }
  0xb0   : > { %1237 = vmatmul.mubr.f32.gmra.mrb[6].mxu0 %v269_v11 }
 0x177   : > { %v384_v12 = vpop.f32.mrb[0].mxu0  ;;  %v1292_v13 = vpop.f32.mrb[0].mxu1 }
 0x178   : > { %493 = vst.msk [vmem:[%s1801_s24] sm:$0xff] %vm492_vm0, %v384_v12  ;;  %509 = vrot.lane.b32.xlu0 %v384_v12, %s1581_s26  ;;  %v386_v14 = vpop.f32.mrb[1].mxu0  ;;  %502 = vst.msk [vmem:[%s1806_s27 + $0x8] sm:$0xff] %vm492_vm0, %v1292_v13  ;;  %553 = vrot.lane.b32.xlu1 %v1292_v13, %s1581_s26  ;;  %v473_v15 = vpop.f32.mrb[1].mxu1 }
 0x179   : > { %497 = vst.msk [vmem:[%s1811_s25] sm:$0xff] %vm492_vm0, %v386_v14  ;;  %501 = vst.msk [vmem:[%s1806_s27] sm:$0xff] %vm492_vm0, %v473_v15 }
 0x17b   : > { %v390_v16 = vpop.f32.mrb[2].mxu0  ;;  %v1295_v17 = vpop.f32.mrb[2].mxu1 }
 0x17c   : > { %568 = vrot.lane.b32.xlu0 %v384_v12, %s1582_s30  ;;  %494 = vst.msk [vmem:[%s1801_s24 + $0x8] sm:$0xff] %vm492_vm0, %v390_v16  ;;  %v392_v18 = vpop.f32.mrb[3].mxu0  ;;  %604 = vrot.lane.b32.xlu1 %v1292_v13, %s1582_s30  ;;  %504 = vst.msk [vmem:[%s1806_s27 + $0x18] sm:$0xff] %vm492_vm0, %v1295_v17  ;;  %v483_v19 = vpop.f32.mrb[3].mxu1 }
 0x17d   : > { %498 = vst.msk [vmem:[%s1811_s25 + $0x8] sm:$0xff] %vm492_vm0, %v392_v18  ;;  %503 = vst.msk [vmem:[%s1806_s27 + $0x10] sm:$0xff] %vm492_vm0, %v483_v19 }
 0x17f   : > { %v396_v20 = vpop.f32.mrb[4].mxu0  ;;  %v747_v60 = vld [vmem:[%s1801_s24] sm:$0xff] (%p1713_p10) }
 0x180   : > { %619 = vrot.lane.b32.xlu0 %v384_v12, %s1583_s13  ;;  %495 = vst.msk [vmem:[%s1801_s24 + $0x10] sm:$0xff] %vm492_vm0, %v396_v20  ;;  %v398_v21 = vpop.f32.mrb[5].mxu0  ;;  %655 = vrot.lane.b32.xlu1 %v1292_v13, %s1583_s13  ;;  %748 = vst [vmem:[%s689_s15] sm:$0xff] (%p1713_p10), %v747_v60 }
 0x181   : > { %499 = vst.msk [vmem:[%s1811_s25 + $0x10] sm:$0xff] %vm492_vm0, %v398_v21 }
 0x183   : > { %v402_v22 = vpop.f32.mrb[6].mxu0  ;;  %v749_v61 = vld [vmem:[%s1801_s24 + $0x8] sm:$0xff] (%p1713_p10) }
 0x184   : > { %530 = vrot.lane.b32.xlu0 %v386_v14, %s1581_s26  ;;  %496 = vst.msk [vmem:[%s1801_s24 + $0x18] sm:$0xff] %vm492_vm0, %v402_v22  ;;  %v404_v23 = vpop.f32.mrb[7].mxu0  ;;  %557 = vrot.lane.b32.xlu1 %v1295_v17, %s1581_s26  ;;  %750 = vst [vmem:[%s689_s15 + $0x8] sm:$0xff] (%p1713_p10), %v749_v61 }
 0x185   : > { %500 = vst.msk [vmem:[%s1811_s25 + $0x18] sm:$0xff] %vm492_vm0, %v404_v23 }
 0x187   : > { %v751_v62 = vld [vmem:[%s1801_s24 + $0x10] sm:$0xff] (%p1713_p10) }
 0x188   : > { %551 = vrot.lane.b32.xlu0 %v473_v15, %s1581_s26  ;;  %570 = vrot.lane.b32.xlu1 %v390_v16, %s1582_s30  ;;  %752 = vst [vmem:[%s689_s15 + $0x10] sm:$0xff] (%p1713_p10), %v751_v62 }
 0x18b   : > { %v753_v63 = vld [vmem:[%s1801_s24 + $0x18] sm:$0xff] (%p1713_p10) }
 0x18c   : > { %585 = vrot.lane.b32.xlu0 %v386_v14, %s1582_s30  ;;  %608 = vrot.lane.b32.xlu1 %v1295_v17, %s1582_s30  ;;  %754 = vst [vmem:[%s689_s15 + $0x18] sm:$0xff] (%p1713_p10), %v753_v63 }
 0x190   : > { %602 = vrot.lane.b32.xlu0 %v473_v15, %s1582_s30  ;;  %621 = vrot.lane.b32.xlu1 %v390_v16, %s1583_s13 }
 0x194   : > { %636 = vrot.lane.b32.xlu0 %v386_v14, %s1583_s13  ;;  %532 = vrot.lane.b32.xlu1 %v392_v18, %s1581_s26 }
 0x198   : > { %653 = vrot.lane.b32.xlu0 %v473_v15, %s1583_s13  ;;  %587 = vrot.lane.b32.xlu1 %v392_v18, %s1582_s30 }
 0x19c   : > { %511 = vrot.lane.b32.xlu0 %v390_v16, %s1581_s26  ;;  %638 = vrot.lane.b32.xlu1 %v392_v18, %s1583_s13 }
 0x1a0   : > { %555 = vrot.lane.b32.xlu0 %v483_v19, %s1581_s26  ;;  %513 = vrot.lane.b32.xlu1 %v396_v20, %s1581_s26 }
 0x1a4   : > { %606 = vrot.lane.b32.xlu0 %v483_v19, %s1582_s30  ;;  %515 = vrot.lane.b32.xlu1 %v402_v22, %s1581_s26 }
 0x1a8   : > { %572 = vrot.lane.b32.xlu0 %v396_v20, %s1582_s30  ;;  %574 = vrot.lane.b32.xlu1 %v402_v22, %s1582_s30 }
 0x1ac   : > { %623 = vrot.lane.b32.xlu0 %v396_v20, %s1583_s13  ;;  %625 = vrot.lane.b32.xlu1 %v402_v22, %s1583_s13 }
 0x1b0   : > { %534 = vrot.lane.b32.xlu0 %v398_v21, %s1581_s26  ;;  %536 = vrot.lane.b32.xlu1 %v404_v23, %s1581_s26 }
 0x1b4   : > { %589 = vrot.lane.b32.xlu0 %v398_v21, %s1582_s30  ;;  %591 = vrot.lane.b32.xlu1 %v404_v23, %s1582_s30 }
 0x1b8   : > { %640 = vrot.lane.b32.xlu0 %v398_v21, %s1583_s13  ;;  %642 = vrot.lane.b32.xlu1 %v404_v23, %s1583_s13 }
 0x1bc   : > { %657 = vrot.lane.b32.xlu0 %v483_v19, %s1583_s13  ;;  %659 = vrot.lane.b32.xlu1 %v1295_v17, %s1583_s13 }
 0x1ea   : > { %v510_v24 = vpop.permute.xlu0 %509  ;;  %v554_v25 = vpop.permute.xlu1 %553 }
 0x1eb   : > { %1148 = vst.msk [vmem:[%s1801_s24 + $0x20] sm:$0xff] %vm492_vm0, %v510_v24  ;;  %1157 = vst.msk [vmem:[%s1806_s27 + $0x28] sm:$0xff] %vm492_vm0, %v554_v25 }
 0x1ee   : > { %v569_v26 = vpop.permute.xlu0 %568  ;;  %v605_v27 = vpop.permute.xlu1 %604 }
 0x1ef   : > { %1160 = vst.msk [vmem:[%s1801_s24 + $0x40] sm:$0xff] %vm492_vm0, %v569_v26  ;;  %1169 = vst.msk [vmem:[%s1806_s27 + $0x48] sm:$0xff] %vm492_vm0, %v605_v27 }
 0x1f2   : > { %v620_v28 = vpop.permute.xlu0 %619  ;;  %v656_v29 = vpop.permute.xlu1 %655  ;;  %v755_v0 = vld [vmem:[%s1801_s24 + $0x20] sm:$0xff] (%p1713_p10) }
 0x1f3   : > { %1172 = vst.msk [vmem:[%s1801_s24 + $0x60] sm:$0xff] %vm492_vm0, %v620_v28  ;;  %1181 = vst.msk [vmem:[%s1806_s27 + $0x68] sm:$0xff] %vm492_vm0, %v656_v29 }
 0x1f4   : > { %756 = vst [vmem:[%s689_s15 + $0x40] sm:$0xff] (%p1713_p10), %v755_v0 }
 0x1f6   : > { %v531_v30 = vpop.permute.xlu0 %530  ;;  %v558_v31 = vpop.permute.xlu1 %557  ;;  %v763_v4 = vld [vmem:[%s1801_s24 + $0x40] sm:$0xff] (%p1713_p10) }
 0x1f7   : > { %1152 = vst.msk [vmem:[%s1811_s25 + $0x20] sm:$0xff] %vm492_vm0, %v531_v30  ;;  %1159 = vst.msk [vmem:[%s1806_s27 + $0x38] sm:$0xff] %vm492_vm0, %v558_v31 }
 0x1f8   : > { %764 = vst [vmem:[%s689_s15 + $0x80] sm:$0xff] (%p1713_p10), %v763_v4 }
 0x1fa   : > { %v552_v32 = vpop.permute.xlu0 %551  ;;  %v571_v33 = vpop.permute.xlu1 %570  ;;  %v771_v8 = vld [vmem:[%s1801_s24 + $0x60] sm:$0xff] (%p1713_p10) }
 0x1fb   : > { %1156 = vst.msk [vmem:[%s1806_s27 + $0x20] sm:$0xff] %vm492_vm0, %v552_v32  ;;  %1161 = vst.msk [vmem:[%s1801_s24 + $0x48] sm:$0xff] %vm492_vm0, %v571_v33 }
 0x1fc   : > { %772 = vst [vmem:[%s689_s15 + $0xc0] sm:$0xff] (%p1713_p10), %v771_v8 }
 0x1fe   : > { %v586_v34 = vpop.permute.xlu0 %585  ;;  %v609_v35 = vpop.permute.xlu1 %608 }
 0x1ff   : > { %1164 = vst.msk [vmem:[%s1811_s25 + $0x40] sm:$0xff] %vm492_vm0, %v586_v34  ;;  %1171 = vst.msk [vmem:[%s1806_s27 + $0x58] sm:$0xff] %vm492_vm0, %v609_v35 }
 0x202   : > { %v603_v36 = vpop.permute.xlu0 %602  ;;  %v622_v37 = vpop.permute.xlu1 %621  ;;  %v765_v5 = vld [vmem:[%s1801_s24 + $0x48] sm:$0xff] (%p1713_p10) }
 0x203   : > { %1168 = vst.msk [vmem:[%s1806_s27 + $0x40] sm:$0xff] %vm492_vm0, %v603_v36  ;;  %1173 = vst.msk [vmem:[%s1801_s24 + $0x68] sm:$0xff] %vm492_vm0, %v622_v37 }
 0x204   : > { %766 = vst [vmem:[%s689_s15 + $0x88] sm:$0xff] (%p1713_p10), %v765_v5 }
 0x206   : > { %v637_v38 = vpop.permute.xlu0 %636  ;;  %v533_v39 = vpop.permute.xlu1 %532 }
 0x207   : > { %1176 = vst.msk [vmem:[%s1811_s25 + $0x60] sm:$0xff] %vm492_vm0, %v637_v38  ;;  %1153 = vst.msk [vmem:[%s1811_s25 + $0x28] sm:$0xff] %vm492_vm0, %v533_v39 }
 0x20a   : > { %v654_v40 = vpop.permute.xlu0 %653  ;;  %v588_v41 = vpop.permute.xlu1 %587  ;;  %v773_v9 = vld [vmem:[%s1801_s24 + $0x68] sm:$0xff] (%p1713_p10) }
 0x20b   : > { %1180 = vst.msk [vmem:[%s1806_s27 + $0x60] sm:$0xff] %vm492_vm0, %v654_v40  ;;  %1165 = vst.msk [vmem:[%s1811_s25 + $0x48] sm:$0xff] %vm492_vm0, %v588_v41 }
 0x20c   : > { %774 = vst [vmem:[%s689_s15 + $0xc8] sm:$0xff] (%p1713_p10), %v773_v9 }
 0x20e   : > { %v512_v42 = vpop.permute.xlu0 %511  ;;  %v639_v43 = vpop.permute.xlu1 %638 }
 0x20f   : > { %1149 = vst.msk [vmem:[%s1801_s24 + $0x28] sm:$0xff] %vm492_vm0, %v512_v42  ;;  %1177 = vst.msk [vmem:[%s1811_s25 + $0x68] sm:$0xff] %vm492_vm0, %v639_v43 }
 0x212   : > { %v556_v44 = vpop.permute.xlu0 %555  ;;  %v514_v45 = vpop.permute.xlu1 %513 }
 0x213   : > { %1158 = vst.msk [vmem:[%s1806_s27 + $0x30] sm:$0xff] %vm492_vm0, %v556_v44  ;;  %1150 = vst.msk [vmem:[%s1801_s24 + $0x30] sm:$0xff] %vm492_vm0, %v514_v45 }
 0x216   : > { %v607_v46 = vpop.permute.xlu0 %606  ;;  %v516_v47 = vpop.permute.xlu1 %515  ;;  %v757_v1 = vld [vmem:[%s1801_s24 + $0x28] sm:$0xff] (%p1713_p10) }
 0x217   : > { %1170 = vst.msk [vmem:[%s1806_s27 + $0x50] sm:$0xff] %vm492_vm0, %v607_v46  ;;  %1151 = vst.msk [vmem:[%s1801_s24 + $0x38] sm:$0xff] %vm492_vm0, %v516_v47 }
 0x218   : > { %758 = vst [vmem:[%s689_s15 + $0x48] sm:$0xff] (%p1713_p10), %v757_v1 }
 0x21a   : > { %v573_v48 = vpop.permute.xlu0 %572  ;;  %v575_v49 = vpop.permute.xlu1 %574  ;;  %v759_v2 = vld [vmem:[%s1801_s24 + $0x30] sm:$0xff] (%p1713_p10) }
 0x21b   : > { %1162 = vst.msk [vmem:[%s1801_s24 + $0x50] sm:$0xff] %vm492_vm0, %v573_v48  ;;  %1163 = vst.msk [vmem:[%s1801_s24 + $0x58] sm:$0xff] %vm492_vm0, %v575_v49 }
 0x21c   : > { %760 = vst [vmem:[%s689_s15 + $0x50] sm:$0xff] (%p1713_p10), %v759_v2 }
 0x21e   : > { %v624_v50 = vpop.permute.xlu0 %623  ;;  %v626_v51 = vpop.permute.xlu1 %625  ;;  %v761_v3 = vld [vmem:[%s1801_s24 + $0x38] sm:$0xff] (%p1713_p10) }
 0x21f   : > { %1174 = vst.msk [vmem:[%s1801_s24 + $0x70] sm:$0xff] %vm492_vm0, %v624_v50  ;;  %1175 = vst.msk [vmem:[%s1801_s24 + $0x78] sm:$0xff] %vm492_vm0, %v626_v51 }
 0x220   : > { %762 = vst [vmem:[%s689_s15 + $0x58] sm:$0xff] (%p1713_p10), %v761_v3 }
 0x222   : > { %v535_v52 = vpop.permute.xlu0 %534  ;;  %v537_v53 = vpop.permute.xlu1 %536  ;;  %v767_v6 = vld [vmem:[%s1801_s24 + $0x50] sm:$0xff] (%p1713_p10)  ;;  %v769_v7 = vld [vmem:[%s1801_s24 + $0x58] sm:$0xff] (%p1713_p10) }
 0x223   : > { %1154 = vst.msk [vmem:[%s1811_s25 + $0x30] sm:$0xff] %vm492_vm0, %v535_v52  ;;  %1155 = vst.msk [vmem:[%s1811_s25 + $0x38] sm:$0xff] %vm492_vm0, %v537_v53 }
 0x224   : > { %768 = vst [vmem:[%s689_s15 + $0x90] sm:$0xff] (%p1713_p10), %v767_v6  ;;  %770 = vst [vmem:[%s689_s15 + $0x98] sm:$0xff] (%p1713_p10), %v769_v7 }
 0x226   : > { %v590_v54 = vpop.permute.xlu0 %589  ;;  %v592_v55 = vpop.permute.xlu1 %591  ;;  %v775_v10 = vld [vmem:[%s1801_s24 + $0x70] sm:$0xff] (%p1713_p10)  ;;  %v777_v11 = vld [vmem:[%s1801_s24 + $0x78] sm:$0xff] (%p1713_p10) }
 0x227   : > { %1166 = vst.msk [vmem:[%s1811_s25 + $0x50] sm:$0xff] %vm492_vm0, %v590_v54  ;;  %1167 = vst.msk [vmem:[%s1811_s25 + $0x58] sm:$0xff] %vm492_vm0, %v592_v55 }
 0x228   : > { %776 = vst [vmem:[%s689_s15 + $0xd0] sm:$0xff] (%p1713_p10), %v775_v10  ;;  %778 = vst [vmem:[%s689_s15 + $0xd8] sm:$0xff] (%p1713_p10), %v777_v11 }
 0x229   : > { %684 = sbr.rel (!%p1713_p10) target bundleno = 560 (0x230), region = 40 }
 0x22a   : > { %v641_v56 = vpop.permute.xlu0 %640  ;;  %v643_v57 = vpop.permute.xlu1 %642 }
 0x22b   : > { %1178 = vst.msk [vmem:[%s1811_s25 + $0x70] sm:$0xff] %vm492_vm0, %v641_v56  ;;  %1179 = vst.msk [vmem:[%s1811_s25 + $0x78] sm:$0xff] %vm492_vm0, %v643_v57 }
 0x22e   : > { %v658_v58 = vpop.permute.xlu0 %657  ;;  %v660_v59 = vpop.permute.xlu1 %659 }
 0x22f   : > { %1182 = vst.msk [vmem:[%s1806_s27 + $0x70] sm:$0xff] %vm492_vm0, %v658_v58  ;;  %1183 = vst.msk [vmem:[%s1806_s27 + $0x78] sm:$0xff] %vm492_vm0, %v660_v59 }
 0x230 PF: > { %784 = sbr.rel (!%p1713_p10) target bundleno = 576 (0x240), region = 78  ;;  %s1190_s23 = sshll.u32 (%p1713_p10), %s1559_s18, 2  ;;  %v847_v12 = vld [vmem:[%s1811_s25] sm:$0xff] (%p1713_p10)  ;;  %v849_v13 = vld [vmem:[%s1811_s25 + $0x8] sm:$0xff] (%p1713_p10)  ;;  %v851_v14 = vld [vmem:[%s1811_s25 + $0x10] sm:$0xff] (%p1713_p10) }
 0x231   : > { %s1191_s6 = sshll.u32 (%p1713_p10), %s1563_s19, 5  ;;  %v853_v15 = vld [vmem:[%s1811_s25 + $0x18] sm:$0xff] (%p1713_p10)  ;;  %v855_v16 = vld [vmem:[%s1811_s25 + $0x20] sm:$0xff] (%p1713_p10)  ;;  %v857_v17 = vld [vmem:[%s1811_s25 + $0x28] sm:$0xff] (%p1713_p10)  ;;  %s2063_s24 = sld [smem:[#allocation13_spill]] (%p1713_p10) }
 0x232   : > { %s787_s1 = sadd.s32 (%p1713_p10), %s1191_s6, %s1190_s23  ;;  %v859_v18 = vld [vmem:[%s1811_s25 + $0x30] sm:$0xff] (%p1713_p10)  ;;  %v861_v19 = vld [vmem:[%s1811_s25 + $0x38] sm:$0xff] (%p1713_p10)  ;;  %v863_v20 = vld [vmem:[%s1811_s25 + $0x40] sm:$0xff] (%p1713_p10) }
 0x233   : > { %s1192_s4 = sshll.u32 (%p1713_p10), %s787_s1, 3  ;;  %v865_v21 = vld [vmem:[%s1811_s25 + $0x48] sm:$0xff] (%p1713_p10)  ;;  %v867_v22 = vld [vmem:[%s1811_s25 + $0x50] sm:$0xff] (%p1713_p10)  ;;  %v869_v23 = vld [vmem:[%s1811_s25 + $0x58] sm:$0xff] (%p1713_p10) }
 0x234   : > { %v871_v24 = vld [vmem:[%s1811_s25 + $0x60] sm:$0xff] (%p1713_p10)  ;;  %v873_v25 = vld [vmem:[%s1811_s25 + $0x68] sm:$0xff] (%p1713_p10)  ;;  %v875_v26 = vld [vmem:[%s1811_s25 + $0x70] sm:$0xff] (%p1713_p10) }
 0x235   : > { %v877_v27 = vld [vmem:[%s1811_s25 + $0x78] sm:$0xff] (%p1713_p10) }
 0x237   : > { %s789_s26 = scalar_lea.vmem %s2063_s24, %s1192_s4 }
 0x238   : > { %848 = vst [vmem:[%s789_s26] sm:$0xff] %v847_v12  ;;  %850 = vst [vmem:[%s789_s26 + $0x8] sm:$0xff] %v849_v13 }
 0x239   : > { %852 = vst [vmem:[%s789_s26 + $0x10] sm:$0xff] %v851_v14  ;;  %854 = vst [vmem:[%s789_s26 + $0x18] sm:$0xff] %v853_v15 }
 0x23a   : > { %856 = vst [vmem:[%s789_s26 + $0x40] sm:$0xff] %v855_v16  ;;  %858 = vst [vmem:[%s789_s26 + $0x48] sm:$0xff] %v857_v17 }
 0x23b   : > { %860 = vst [vmem:[%s789_s26 + $0x50] sm:$0xff] %v859_v18  ;;  %862 = vst [vmem:[%s789_s26 + $0x58] sm:$0xff] %v861_v19 }
 0x23c   : > { %864 = vst [vmem:[%s789_s26 + $0x80] sm:$0xff] %v863_v20  ;;  %866 = vst [vmem:[%s789_s26 + $0x88] sm:$0xff] %v865_v21 }
 0x23d   : > { %868 = vst [vmem:[%s789_s26 + $0x90] sm:$0xff] %v867_v22  ;;  %870 = vst [vmem:[%s789_s26 + $0x98] sm:$0xff] %v869_v23 }
 0x23e   : > { %872 = vst [vmem:[%s789_s26 + $0xc0] sm:$0xff] %v871_v24  ;;  %874 = vst [vmem:[%s789_s26 + $0xc8] sm:$0xff] %v873_v25 }
 0x23f   : > { %876 = vst [vmem:[%s789_s26 + $0xd0] sm:$0xff] %v875_v26  ;;  %878 = vst [vmem:[%s789_s26 + $0xd8] sm:$0xff] %v877_v27 }
 0x240 PF: > { %884 = sbr.rel (!%p1713_p10) target bundleno = 592 (0x250), region = 116  ;;  %s1193_s30 = sshll.u32 (%p1713_p10), %s1559_s18, 2  ;;  %v947_v28 = vld [vmem:[%s1806_s27] sm:$0xff] (%p1713_p10)  ;;  %v949_v29 = vld [vmem:[%s1806_s27 + $0x8] sm:$0xff] (%p1713_p10)  ;;  %v951_v30 = vld [vmem:[%s1806_s27 + $0x10] sm:$0xff] (%p1713_p10) }
 0x241   : > { %s1194_s25 = sshll.u32 (%p1713_p10), %s1563_s19, 5  ;;  %v953_v31 = vld [vmem:[%s1806_s27 + $0x18] sm:$0xff] (%p1713_p10)  ;;  %v955_v32 = vld [vmem:[%s1806_s27 + $0x20] sm:$0xff] (%p1713_p10)  ;;  %v957_v33 = vld [vmem:[%s1806_s27 + $0x28] sm:$0xff] (%p1713_p10)  ;;  %s2064_s8 = sld [smem:[#allocation14_spill]] (%p1713_p10) }
 0x242   : > { %s887_s29 = sadd.s32 (%p1713_p10), %s1194_s25, %s1193_s30  ;;  %v959_v34 = vld [vmem:[%s1806_s27 + $0x30] sm:$0xff] (%p1713_p10)  ;;  %v961_v35 = vld [vmem:[%s1806_s27 + $0x38] sm:$0xff] (%p1713_p10)  ;;  %v963_v36 = vld [vmem:[%s1806_s27 + $0x40] sm:$0xff] (%p1713_p10) }
 0x243   : > { %s1195_s13 = sshll.u32 (%p1713_p10), %s887_s29, 3  ;;  %v965_v37 = vld [vmem:[%s1806_s27 + $0x48] sm:$0xff] (%p1713_p10)  ;;  %v967_v38 = vld [vmem:[%s1806_s27 + $0x50] sm:$0xff] (%p1713_p10)  ;;  %v969_v39 = vld [vmem:[%s1806_s27 + $0x58] sm:$0xff] (%p1713_p10) }
 0x244   : > { %v971_v40 = vld [vmem:[%s1806_s27 + $0x60] sm:$0xff] (%p1713_p10)  ;;  %v973_v41 = vld [vmem:[%s1806_s27 + $0x68] sm:$0xff] (%p1713_p10)  ;;  %v975_v42 = vld [vmem:[%s1806_s27 + $0x70] sm:$0xff] (%p1713_p10) }
 0x245   : > { %v977_v43 = vld [vmem:[%s1806_s27 + $0x78] sm:$0xff] (%p1713_p10) }
 0x247   : > { %s889_s10 = scalar_lea.vmem %s2064_s8, %s1195_s13 }
 0x248   : > { %948 = vst [vmem:[%s889_s10] sm:$0xff] %v947_v28  ;;  %950 = vst [vmem:[%s889_s10 + $0x8] sm:$0xff] %v949_v29 }
 0x249   : > { %952 = vst [vmem:[%s889_s10 + $0x10] sm:$0xff] %v951_v30  ;;  %954 = vst [vmem:[%s889_s10 + $0x18] sm:$0xff] %v953_v31 }
 0x24a   : > { %956 = vst [vmem:[%s889_s10 + $0x40] sm:$0xff] %v955_v32  ;;  %958 = vst [vmem:[%s889_s10 + $0x48] sm:$0xff] %v957_v33 }
 0x24b   : > { %960 = vst [vmem:[%s889_s10 + $0x50] sm:$0xff] %v959_v34  ;;  %962 = vst [vmem:[%s889_s10 + $0x58] sm:$0xff] %v961_v35 }
 0x24c   : > { %964 = vst [vmem:[%s889_s10 + $0x80] sm:$0xff] %v963_v36  ;;  %966 = vst [vmem:[%s889_s10 + $0x88] sm:$0xff] %v965_v37 }
 0x24d   : > { %968 = vst [vmem:[%s889_s10 + $0x90] sm:$0xff] %v967_v38  ;;  %970 = vst [vmem:[%s889_s10 + $0x98] sm:$0xff] %v969_v39 }
 0x24e   : > { %972 = vst [vmem:[%s889_s10 + $0xc0] sm:$0xff] %v971_v40  ;;  %974 = vst [vmem:[%s889_s10 + $0xc8] sm:$0xff] %v973_v41 }
 0x24f   : > { %976 = vst [vmem:[%s889_s10 + $0xd0] sm:$0xff] %v975_v42  ;;  %978 = vst [vmem:[%s889_s10 + $0xd8] sm:$0xff] %v977_v43 }
 0x250 PF: > { %s19_s22 = sadd.s32 1, %s1575_s22   ;;  %s2065_s11 = sld [smem:[#allocation11_spill]] }
 0x251   : > { %p16_p10 = scmp.ge.s32.totalorder %s19_s22, 6   ;;  %s2066_s15 = smov %s1551_s16 }
 0x252   : > { %s2067_s16 = smov %s1555_s17  ;;  %s2068_s17 = smov %s1726_s14 }
 0x253   : > { %s2069_s18 = smov %s1567_s20  ;;  %s2070_s19 = smov %s1571_s21 }
 0x254   : > { %s2072_s21 = smov %s2078_s5  ;;  %18 = sbr.rel (!%p16_p10) target bundleno = 10 (0xa), region = 219 }
 0x256   : > { %s2071_s20 = smov %s2065_s11 }
 0x25b   :  { %1008 = vsyncpa [#allocation3], 1 }
 0x25c   :  { %1010 = vsyncpa [#allocation3 + $0x1], 1 }
 0x25d   :  { %1011 = vsyncpa [#allocation5], 1 }

</bundles_post_ra>
